<compile_context>
chip_gen: v6e
topology: v6e:2x2x1
jax: 0.10.0
libtpu: 0.0.40
codegen_flags: <defaults>
</compile_context>

<pallas_src>
import jax
import jax.numpy as jnp
from jax import lax
from jax.experimental import pallas as pl
from jax.experimental.pallas import tpu as pltpu


def _round_up(x: int, m: int) -> int:
    return ((x + m - 1) // m) * m


def _sigmoid(x):
    # EUP-friendly sigmoid: one tanh instead of exp + divide.
    return 0.5 * (jnp.tanh(0.5 * x) + 1.0)


def mlp_kernel(x_ref, w1_ref, b1_ref, w2_ref, b2_ref, out_ref):
    # x_ref:  (B_pad, D_in_pad)        w1_ref: (H_pad, D_in_pad)   b1_ref: (1, H_pad)
    # w2_ref: (D_out_pad, H_pad)       b2_ref: (1, D_out_pad)      out_ref: (B_pad, D_out_pad)
    x = x_ref[...]
    # First linear: contract x's last axis with w1's last axis (PyTorch [out, in]
    # layout, no transpose needed); f32 accumulate on the MXU.
    h = lax.dot_general(
        x, w1_ref[...],
        dimension_numbers=(((1,), (1,)), ((), ())),
        preferred_element_type=jnp.float32,
    ) + b1_ref[...]
    h = _sigmoid(h)
    # Second linear + sigmoid.
    o = lax.dot_general(
        h, w2_ref[...],
        dimension_numbers=(((1,), (1,)), ((), ())),
        preferred_element_type=jnp.float32,
    ) + b2_ref[...]
    o = _sigmoid(o)
    out_ref[...] = o.astype(out_ref.dtype)


def prepare_params(w1, b1, w2, b2):
    """One-time parameter prep: keep PyTorch [out, in] layout, zero-pad feature
    dims to lane-dense multiples of 128. Zero padding is exact: padded hidden
    units feed zero weights in layer 2, padded output columns are sliced off."""
    hidden, d_in = w1.shape
    d_out = w2.shape[0]
    d_in_pad = _round_up(d_in, 128)
    h_pad = _round_up(hidden, 128)
    d_out_pad = _round_up(d_out, 128)

    w1_p = jnp.zeros((h_pad, d_in_pad), jnp.float32).at[:hidden, :d_in].set(w1)
    b1_p = jnp.zeros((1, h_pad), jnp.float32).at[0, :hidden].set(b1)
    w2_p = jnp.zeros((d_out_pad, h_pad), jnp.float32).at[:d_out, :hidden].set(w2)
    b2_p = jnp.zeros((1, d_out_pad), jnp.float32).at[0, :d_out].set(b2)
    return (w1_p, b1_p, w2_p, b2_p, d_out)


def neural_network_forward(x_nchw, params):
    """Forward pass matching the PyTorch NeuralNetwork module.

    x_nchw: [B, C, H, W] float32
    params: output of prepare_params (padded, PyTorch-layout weights)
    Returns: [B, output_size] float32
    """
    w1_p, b1_p, w2_p, b2_p, d_out = params
    B = x_nchw.shape[0]
    x_flat = x_nchw.reshape(B, -1)                    # nn.Flatten (glue)
    d_in = x_flat.shape[1]

    b_pad = _round_up(B, 8)
    d_in_pad = w1_p.shape[1]
    if (b_pad, d_in_pad) != (B, d_in):
        x_flat = jnp.pad(x_flat, ((0, b_pad - B), (0, d_in_pad - d_in)))

    d_out_pad = w2_p.shape[0]
    vmem = pl.BlockSpec(memory_space=pltpu.MemorySpace.VMEM)

    out_pad = pl.pallas_call(
        mlp_kernel,
        out_shape=jax.ShapeDtypeStruct((b_pad, d_out_pad), jnp.float32),
        in_specs=[vmem, vmem, vmem, vmem, vmem],
        out_specs=vmem,
    )(x_flat, w1_p, b1_p, w2_p, b2_p)

    return out_pad[:B, :d_out]


if __name__ == "__main__":
    # Small shapes consistent with the module: 16x16 single-channel "digits",
    # input_size = 1*16*16 = 256, hidden_size = 32, output_size = 10.
    B, C, H, W = 8, 1, 16, 16
    input_size = C * H * W
    hidden_size = 32
    output_size = 10

    key = jax.random.PRNGKey(0)
    kx, kw1, kb1, kw2, kb2 = jax.random.split(key, 5)

    x = jax.random.normal(kx, (B, C, H, W), dtype=jnp.float32)
    # PyTorch nn.Linear layout: [out, in].
    w1 = jax.random.normal(kw1, (hidden_size, input_size), dtype=jnp.float32) * 0.05
    b1 = jax.random.normal(kb1, (hidden_size,), dtype=jnp.float32) * 0.05
    w2 = jax.random.normal(kw2, (output_size, hidden_size), dtype=jnp.float32) * 0.05
    b2 = jax.random.normal(kb2, (output_size,), dtype=jnp.float32) * 0.05

    params = prepare_params(w1, b1, w2, b2)   # one-time pad (no per-call transposes)

    out = neural_network_forward(x, params)
    out = jax.block_until_ready(out)

    # Pure-JAX reference check of forward semantics.
    x_flat = x.reshape(B, -1)
    ref = jax.nn.sigmoid(jax.nn.sigmoid(x_flat @ w1.T + b1) @ w2.T + b2)
    assert out.shape == (B, output_size)
    assert jnp.allclose(out, ref, atol=1e-5, rtol=1e-5)

    print("KERNEL_OK")
</pallas_src>

<mosaic_0001>
module attributes {stable_mosaic.version = 11 : i64} {
  func.func @mlp_kernel(%arg0: memref<8x256xf32, #tpu.memory_space<vmem>>, %arg1: memref<128x256xf32, #tpu.memory_space<vmem>>, %arg2: memref<1x128xf32, #tpu.memory_space<vmem>>, %arg3: memref<128x128xf32, #tpu.memory_space<vmem>>, %arg4: memref<1x128xf32, #tpu.memory_space<vmem>>, %arg5: memref<8x128xf32, #tpu.memory_space<vmem>>) attributes {dimension_semantics = [], scalar_prefetch = 0 : i64, scratch_operands = 0 : i64, tpu.core_type = #tpu.core_type<tc>} {
    %c0 = arith.constant 0 : index
    %c0_0 = arith.constant 0 : index
    %0 = vector.load %arg0[%c0, %c0_0] : memref<8x256xf32, #tpu.memory_space<vmem>>, vector<8x256xf32>
    %c0_1 = arith.constant 0 : index
    %c0_2 = arith.constant 0 : index
    %1 = vector.load %arg1[%c0_1, %c0_2] : memref<128x256xf32, #tpu.memory_space<vmem>>, vector<128x256xf32>
    %cst = arith.constant dense<0.000000e+00> : vector<8x128xf32>
    %2 = tpu.matmul %0, %1, %cst {dimension_numbers = #tpu.dot_dimension_numbers<[1], [1], [0], [0], [0, 0, 1, 0], [], []>} : vector<8x256xf32>, vector<128x256xf32>, vector<8x128xf32> -> vector<8x128xf32>
    %c0_3 = arith.constant 0 : index
    %c0_4 = arith.constant 0 : index
    %3 = vector.load %arg2[%c0_3, %c0_4] : memref<1x128xf32, #tpu.memory_space<vmem>>, vector<1x128xf32>
    %4 = vector.broadcast %3 : vector<1x128xf32> to vector<8x128xf32>
    %5 = arith.addf %2, %4 : vector<8x128xf32>
    %cst_5 = arith.constant 5.000000e-01 : f32
    %6 = vector.broadcast %cst_5 : f32 to vector<8x128xf32>
    %7 = arith.mulf %6, %5 : vector<8x128xf32>
    %8 = math.tanh %7 : vector<8x128xf32>
    %cst_6 = arith.constant 1.000000e+00 : f32
    %9 = vector.broadcast %cst_6 : f32 to vector<8x128xf32>
    %10 = arith.addf %8, %9 : vector<8x128xf32>
    %cst_7 = arith.constant 5.000000e-01 : f32
    %11 = vector.broadcast %cst_7 : f32 to vector<8x128xf32>
    %12 = arith.mulf %11, %10 : vector<8x128xf32>
    %c0_8 = arith.constant 0 : index
    %c0_9 = arith.constant 0 : index
    %13 = vector.load %arg3[%c0_8, %c0_9] : memref<128x128xf32, #tpu.memory_space<vmem>>, vector<128x128xf32>
    %cst_10 = arith.constant dense<0.000000e+00> : vector<8x128xf32>
    %14 = tpu.matmul %12, %13, %cst_10 {dimension_numbers = #tpu.dot_dimension_numbers<[1], [1], [0], [0], [0, 0, 1, 0], [], []>} : vector<8x128xf32>, vector<128x128xf32>, vector<8x128xf32> -> vector<8x128xf32>
    %c0_11 = arith.constant 0 : index
    %c0_12 = arith.constant 0 : index
    %15 = vector.load %arg4[%c0_11, %c0_12] : memref<1x128xf32, #tpu.memory_space<vmem>>, vector<1x128xf32>
    %16 = vector.broadcast %15 : vector<1x128xf32> to vector<8x128xf32>
    %17 = arith.addf %14, %16 : vector<8x128xf32>
    %cst_13 = arith.constant 5.000000e-01 : f32
    %18 = vector.broadcast %cst_13 : f32 to vector<8x128xf32>
    %19 = arith.mulf %18, %17 : vector<8x128xf32>
    %20 = math.tanh %19 : vector<8x128xf32>
    %cst_14 = arith.constant 1.000000e+00 : f32
    %21 = vector.broadcast %cst_14 : f32 to vector<8x128xf32>
    %22 = arith.addf %20, %21 : vector<8x128xf32>
    %cst_15 = arith.constant 5.000000e-01 : f32
    %23 = vector.broadcast %cst_15 : f32 to vector<8x128xf32>
    %24 = arith.mulf %23, %22 : vector<8x128xf32>
    %c0_16 = arith.constant 0 : index
    %c0_17 = arith.constant 0 : index
    %25 = vector.load %arg5[%c0_16, %c0_17] : memref<8x128xf32, #tpu.memory_space<vmem>>, vector<8x128xf32>
    tpu.vector_store %arg5[%c0_16, %c0_17], %24 {strides = array<i32>} : memref<8x128xf32, #tpu.memory_space<vmem>>, vector<8x128xf32>,
    return
  }
}

</mosaic_0001>

<bundles_post_ra>
// kernel: tpu_custom_call.1
= control target key start
LH: loop header
LB: loop body
LE: loop exit
PB: predicated region body
PF: predicated region fallthrough
CT: control target
= control target key end

     0   :  { %10 = vsyncpa [#allocation3], 0  ;;  %s518_s0 = inlined_call_operand.hbm [shape: f32[8,256], index: 0, kind: input, shape index: {}]   ;;  %s519_s1 = inlined_call_operand.hbm [shape: f32[128,256], index: 1, kind: input, shape index: {}]   ;;  %s520_s2 = inlined_call_operand.vmem [shape: f32[1,128], index: 2, kind: input, shape index: {}]   ;;  %s521_s3 = inlined_call_operand.hbm [shape: f32[128,128], index: 3, kind: input, shape index: {}]   ;;  %s522_s4 = inlined_call_operand.vmem [shape: f32[1,128], index: 4, kind: input, shape index: {}]   ;;  %s523_s5 = inlined_call_operand.hbm [shape: f32[8,128], index: 5, kind: output, shape index: {}]  }
   0x1   :  { %11 = vsyncpa [#allocation6], 0 }
   0x2   :  { %12 = vsyncpa [#allocation4], 0  ;;  %s443_s18 = smov [#allocation5]  }
   0x3   :  { %s28_s19 = sshll.u32 %s443_s18, 4  ;;  %s29_s19 = int_to_ptr.vmem [resolvable:$true] %s28_s19 }
   0x4   :  { %s365_s20 = scalar_lea.vmem %s29_s19, 4096  ;;  %p370_p1 = scmp.lt.s32.totalorder %s29_s19, %s29_s19 }
   0x5   :  { %p366_p0 = scmp.ne.s32.totalorder %s29_s19, %s365_s20  ;;  %p371_p2 = scmp.lt.s32.totalorder %s365_s20, %s365_s20 }
   0x7   :  { %p372_p3 = por %p371_p2, %p370_p1 }
   0x9   :  { %p373_p4 = pnand %p372_p3, %p366_p0 }
   0xb   :  { %376 = shalt.err (!%p373_p4)
}
   0xc   :  { %s444_s21 = smov 256   ;;  %s445_s22 = smov 16  }
   0xd   :  { %34 = dma.hbm_to_vmem [thread:$0]  %s519_s1, 4096, %s29_s19, [#allocation6], %s444_s21, %s444_s21, %s445_s22  }
   0xe   :  { %s446_s25 = smov [#allocation2]   ;;  %s447_s27 = smov [#allocation7]  }
   0xf   :  { %s19_s26 = sshll.u32 %s446_s25, 4  ;;  %s42_s28 = sshll.u32 %s447_s27, 4  ;;  %s20_s26 = int_to_ptr.vmem [resolvable:$true] %s19_s26  ;;  %s43_s28 = int_to_ptr.vmem [resolvable:$true] %s42_s28 }
  0x10   :  { %s385_s29 = scalar_lea.vmem %s20_s26, 256  ;;  %p390_p6 = scmp.lt.s32.totalorder %s20_s26, %s20_s26 }
  0x11   :  { %p386_p5 = scmp.ne.s32.totalorder %s20_s26, %s385_s29  ;;  %p391_p7 = scmp.lt.s32.totalorder %s385_s29, %s385_s29 }
  0x13   :  { %p392_p8 = por %p391_p7, %p390_p6 }
  0x15   :  { %p393_p9 = pnand %p392_p8, %p386_p5 }
  0x17   :  { %396 = shalt.err (!%p393_p9)
}
  0x18   :  { %22 = dma.hbm_to_vmem [thread:$0]  %s518_s0, 256, %s20_s26, [#allocation3]  }
  0x19   :  { %s405_s7 = scalar_lea.vmem %s43_s28, 2048  ;;  %p410_p11 = scmp.lt.s32.totalorder %s43_s28, %s43_s28 }
  0x1a   :  { %p406_p10 = scmp.ne.s32.totalorder %s43_s28, %s405_s7  ;;  %p411_p12 = scmp.lt.s32.totalorder %s405_s7, %s405_s7 }
  0x1c   :  { %p412_p13 = por %p411_p12, %p410_p11 }
  0x1e   :  { %p413_p0 = pnand %p412_p13, %p406_p10 }
  0x20   :  { %416 = shalt.err (!%p413_p0)
}
  0x21   :  { %s448_s1 = smov 128   ;;  %s449_s8 = smov 8  }
  0x22   :  { %48 = dma.hbm_to_vmem [thread:$0]  %s521_s3, 2048, %s43_s28, [#allocation6], %s448_s1, %s448_s1, %s449_s8  }
  0x23   :  { %437 = dma.done.wait [#allocation3], 256  }
  0x24   :  { %438 = vsyncadd [#allocation3], 4294967040 }
  0x25   :  { %439 = dma.done.wait [#allocation6], 6144  }
  0x26   :  { %440 = vsyncadd [#allocation6], 4294961152  ;;  %v450_v0 = vmov 0.0   ;;  %v93_v1 = vld [vmem:[#allocation5 + $0xf8] sm:$0xff]  ;;  %v92_v2 = vld [vmem:[#allocation5 + $0xf0] sm:$0xff]  ;;  %vm451_vm0 = vmmov 0  }
  0x27   :  { %308 = vmatprep.subr.mxu1 %v450_v0  ;;  %v91_v3 = vld [vmem:[#allocation5 + $0xe8] sm:$0xff]  ;;  %101 = vmatprep.subr.mxu0 %v93_v1  ;;  %v90_v4 = vld [vmem:[#allocation5 + $0xe0] sm:$0xff]  ;;  %v89_v5 = vld [vmem:[#allocation5 + $0xd8] sm:$0xff] }
  0x28   :  { %102 = vmatpush1.xpose.msra.mxu0 %v92_v2  ;;  %v88_v6 = vld [vmem:[#allocation5 + $0xd0] sm:$0xff]  ;;  %v87_v7 = vld [vmem:[#allocation5 + $0xc8] sm:$0xff]  ;;  %v61_v8 = vld [vmem:[#allocation2 + $0x8] sm:$0xff]  ;;  %340 = vmatprep.mubr.msk.f32.mxu1 %vm451_vm0, %v450_v0 }
  0x29   :  { %103 = vmatprep.subr.mxu0 %v91_v3  ;;  %v86_v9 = vld [vmem:[#allocation5 + $0xc0] sm:$0xff]  ;;  %165 = vmatprep.mubr.f32.mxu0 %v61_v8  ;;  %v190_v10 = vld [vmem:[#allocation7 + $0x78] sm:$0xff]  ;;  %v189_v12 = vld [vmem:[#allocation7 + $0x70] sm:$0xff] }
  0x2a   :  { %v85_v11 = vld [vmem:[#allocation5 + $0xb8] sm:$0xff]  ;;  %309 = vmatpush3.xpose.msra.mxu1 %v190_v10  ;;  %v84_v13 = vld [vmem:[#allocation5 + $0xb0] sm:$0xff]  ;;  %v83_v14 = vld [vmem:[#allocation5 + $0xa8] sm:$0xff] }
  0x2b   :  { %310 = vmatprep.subr.mxu1 %v450_v0  ;;  %v188_v15 = vld [vmem:[#allocation7 + $0x68] sm:$0xff]  ;;  %v82_v16 = vld [vmem:[#allocation5 + $0xa0] sm:$0xff]  ;;  %v81_v17 = vld [vmem:[#allocation5 + $0x98] sm:$0xff] }
  0x2c   :  { %104 = vmatpush1.xpose.msra.mxu0 %v90_v4  ;;  %v187_v18 = vld [vmem:[#allocation7 + $0x60] sm:$0xff]  ;;  %v80_v19 = vld [vmem:[#allocation5 + $0x90] sm:$0xff]  ;;  %v79_v20 = vld [vmem:[#allocation5 + $0x88] sm:$0xff] }
  0x2d   :  { %105 = vmatprep.subr.mxu0 %v89_v5  ;;  %v186_v21 = vld [vmem:[#allocation7 + $0x58] sm:$0xff]  ;;  %v78_v22 = vld [vmem:[#allocation5 + $0x80] sm:$0xff]  ;;  %v185_v24 = vld [vmem:[#allocation7 + $0x50] sm:$0xff] }
  0x2e   :  { %311 = vmatpush3.xpose.msra.mxu1 %v189_v12  ;;  %v77_v23 = vld [vmem:[#allocation5 + $0x78] sm:$0xff]  ;;  %v76_v25 = vld [vmem:[#allocation5 + $0x70] sm:$0xff]  ;;  %v75_v26 = vld [vmem:[#allocation5 + $0x68] sm:$0xff] }
  0x2f   :  { %312 = vmatprep.subr.mxu1 %v450_v0  ;;  %v184_v27 = vld [vmem:[#allocation7 + $0x48] sm:$0xff]  ;;  %v74_v28 = vld [vmem:[#allocation5 + $0x60] sm:$0xff]  ;;  %v73_v29 = vld [vmem:[#allocation5 + $0x58] sm:$0xff] }
  0x30   :  { %106 = vmatpush1.xpose.msra.mxu0 %v88_v6  ;;  %v183_v30 = vld [vmem:[#allocation7 + $0x40] sm:$0xff]  ;;  %v72_v31 = vld [vmem:[#allocation5 + $0x50] sm:$0xff]  ;;  %v71_v32 = vld [vmem:[#allocation5 + $0x48] sm:$0xff] }
  0x31   :  { %107 = vmatprep.subr.mxu0 %v87_v7  ;;  %v182_v33 = vld [vmem:[#allocation7 + $0x38] sm:$0xff]  ;;  %v70_v34 = vld [vmem:[#allocation5 + $0x40] sm:$0xff]  ;;  %v181_v36 = vld [vmem:[#allocation7 + $0x30] sm:$0xff] }
  0x32   :  { %313 = vmatpush3.xpose.msra.mxu1 %v188_v15  ;;  %v69_v35 = vld [vmem:[#allocation5 + $0x38] sm:$0xff]  ;;  %v68_v37 = vld [vmem:[#allocation5 + $0x30] sm:$0xff]  ;;  %v67_v38 = vld [vmem:[#allocation5 + $0x28] sm:$0xff] }
  0x33   :  { %314 = vmatprep.subr.mxu1 %v450_v0  ;;  %v66_v39 = vld [vmem:[#allocation5 + $0x20] sm:$0xff]  ;;  %v65_v40 = vld [vmem:[#allocation5 + $0x18] sm:$0xff]  ;;  %v64_v41 = vld [vmem:[#allocation5 + $0x10] sm:$0xff] }
  0x34   :  { %108 = vmatpush1.xpose.msra.mxu0 %v86_v9  ;;  %v63_v42 = vld [vmem:[#allocation5 + $0x8] sm:$0xff]  ;;  %v62_v43 = vld [vmem:[#allocation5] sm:$0xff]  ;;  %v60_v44 = vld [vmem:[#allocation2] sm:$0xff] }
  0x35   :  { %109 = vmatprep.subr.mxu0 %v85_v11  ;;  %v180_v45 = vld [vmem:[#allocation7 + $0x28] sm:$0xff]  ;;  %v179_v46 = vld [vmem:[#allocation7 + $0x20] sm:$0xff]  ;;  %v178_v47 = vld [vmem:[#allocation7 + $0x18] sm:$0xff] }
  0x36   :  { %315 = vmatpush3.xpose.msra.mxu1 %v187_v18  ;;  %v177_v48 = vld [vmem:[#allocation7 + $0x10] sm:$0xff]  ;;  %v176_v49 = vld [vmem:[#allocation7 + $0x8] sm:$0xff]  ;;  %v175_v50 = vld [vmem:[#allocation7] sm:$0xff] }
  0x37   :  { %316 = vmatprep.subr.mxu1 %v450_v0  ;;  %v289_v51 = vld [vmem:[%s520_s2] ss:$0 sm:$0xff]  ;;  %s452_s2 = smov [#allocation8]  }
  0x38   :  { %110 = vmatpush1.xpose.msra.mxu0 %v84_v13  ;;  %v290_v59 = vld [vmem:[%s522_s4] ss:$0 sm:$0xff]  ;;  %s279_s13 = sshll.u32 %s452_s2, 4  ;;  %s280_s13 = int_to_ptr.vmem [resolvable:$true] %s279_s13 }
  0x39   :  { %111 = vmatprep.subr.mxu0 %v83_v14  ;;  %s417_s14 = scalar_lea.vmem %s280_s13, 128  ;;  %p422_p2 = scmp.lt.s32.totalorder %s280_s13, %s280_s13 }
  0x3a   :  { %317 = vmatpush3.xpose.msra.mxu1 %v186_v21  ;;  %p418_p1 = scmp.ne.s32.totalorder %s280_s13, %s417_s14  ;;  %p423_p3 = scmp.lt.s32.totalorder %s417_s14, %s417_s14 }
  0x3b   :  { %318 = vmatprep.subr.mxu1 %v450_v0 }
  0x3c   :  { %112 = vmatpush1.xpose.msra.mxu0 %v82_v16  ;;  %p424_p4 = por %p423_p3, %p422_p2 }
  0x3d   :  { %113 = vmatprep.subr.mxu0 %v81_v17 }
  0x3e   :  { %319 = vmatpush3.xpose.msra.mxu1 %v185_v24  ;;  %p425_p5 = pnand %p424_p4, %p418_p1 }
  0x3f   :  { %320 = vmatprep.subr.mxu1 %v450_v0 }
  0x40   :  { %114 = vmatpush1.xpose.msra.mxu0 %v80_v19 }
  0x41   :  { %115 = vmatprep.subr.mxu0 %v79_v20 }
  0x42   :  { %321 = vmatpush3.xpose.msra.mxu1 %v184_v27 }
  0x43   :  { %322 = vmatprep.subr.mxu1 %v450_v0 }
  0x44   :  { %116 = vmatpush1.xpose.msra.mxu0 %v78_v22 }
  0x45   :  { %117 = vmatprep.subr.mxu0 %v77_v23 }
  0x46   :  { %323 = vmatpush3.xpose.msra.mxu1 %v183_v30 }
  0x47   :  { %324 = vmatprep.subr.mxu1 %v450_v0 }
  0x48   :  { %118 = vmatpush1.xpose.msra.mxu0 %v76_v25 }
  0x49   :  { %119 = vmatprep.subr.mxu0 %v75_v26 }
  0x4a   :  { %325 = vmatpush3.xpose.msra.mxu1 %v182_v33 }
  0x4b   :  { %326 = vmatprep.subr.mxu1 %v450_v0 }
  0x4c   :  { %120 = vmatpush1.xpose.msra.mxu0 %v74_v28 }
  0x4d   :  { %121 = vmatprep.subr.mxu0 %v73_v29 }
  0x4e   :  { %327 = vmatpush3.xpose.msra.mxu1 %v181_v36 }
  0x4f   :  { %328 = vmatprep.subr.mxu1 %v450_v0 }
  0x50   :  { %122 = vmatpush1.xpose.msra.mxu0 %v72_v31 }
  0x51   :  { %123 = vmatprep.subr.mxu0 %v71_v32 }
  0x52   :  { %329 = vmatpush3.xpose.msra.mxu1 %v180_v45 }
  0x53   :  { %330 = vmatprep.subr.mxu1 %v450_v0 }
  0x54   :  { %124 = vmatpush1.xpose.msra.mxu0 %v70_v34 }
  0x55   :  { %125 = vmatprep.subr.mxu0 %v69_v35 }
  0x56   :  { %331 = vmatpush3.xpose.msra.mxu1 %v179_v46 }
  0x57   :  { %332 = vmatprep.subr.mxu1 %v450_v0 }
  0x58   :  { %126 = vmatpush1.xpose.msra.mxu0 %v68_v37 }
  0x59   :  { %127 = vmatprep.subr.mxu0 %v67_v38 }
  0x5a   :  { %333 = vmatpush3.xpose.msra.mxu1 %v178_v47 }
  0x5b   :  { %334 = vmatprep.subr.mxu1 %v450_v0 }
  0x5c   :  { %128 = vmatpush1.xpose.msra.mxu0 %v66_v39 }
  0x5d   :  { %129 = vmatprep.subr.mxu0 %v65_v40 }
  0x5e   :  { %335 = vmatpush3.xpose.msra.mxu1 %v177_v48 }
  0x5f   :  { %336 = vmatprep.subr.mxu1 %v450_v0 }
  0x60   :  { %130 = vmatpush1.xpose.msra.mxu0 %v64_v41 }
  0x61   :  { %131 = vmatprep.subr.mxu0 %v63_v42 }
  0x62   :  { %337 = vmatpush3.xpose.msra.mxu1 %v176_v49 }
  0x63   :  { %338 = vmatprep.subr.mxu1 %v450_v0 }
  0x64   :  { %132 = vmatpush1.xpose.msra.mxu0 %v62_v43 }
  0x66   :  { %339 = vmatpush3.xpose.msra.mxu1 %v175_v50 }
  0x67   :  { %166 = vmatmul.mubr.f32.vlgmr.msra.gmra.mxu0 %v60_v44 }
 0x127   :  { %v167_v52 = vpop.f32.mrf.mxu0 }
 0x128   :  { %v168_v53 = vadd.f32 %v289_v51, %v167_v52 }
 0x129   :  { %v169_v54 = vpop.f32.mrf.mxu0 }
 0x12a   :  { %v171_v55 = vmul.f32 0.5, %v168_v53 }
 0x12c   :  { %353 = vtanh.f32 %v171_v55 }
 0x139   :  { %v354_v56 = vpop.eup %353 }
 0x13a   :  { %v173_v57 = vadd.f32 1.0, %v354_v56 }
 0x13c   :  { %v174_v58 = vmul.f32 0.5, %v173_v57 }
 0x13e   :  { %341 = vmatmul.mubr.f32.vlgmr.msra.gmra.mxu1 %v174_v58 }
 0x1fe   :  { %v264_v60 = vpop.f32.mrf.mxu1 }
 0x1ff   :  { %v265_v61 = vadd.f32 %v290_v59, %v264_v60 }
 0x200   :  { %v342_v62 = vpop.f32.mrf.mxu1 }
 0x201   :  { %v268_v63 = vmul.f32 0.5, %v265_v61 }
 0x203   :  { %355 = vtanh.f32 %v268_v63 }
 0x210   :  { %v356_v0 = vpop.eup %355 }
 0x211   :  { %v270_v1 = vadd.f32 1.0, %v356_v0 }
 0x213   :  { %v271_v2 = vmul.f32 0.5, %v270_v1 }
 0x215   :  { %272 = vst [vmem:[#allocation8] sm:$0xff] %v271_v2 }
 0x216   :  { %428 = shalt.err (!%p425_p5)
}
 0x217   :  { %282 = dma.vmem_to_hbm [thread:$0]  %s280_s13, 128, %s523_s5, [#allocation4]  }
 0x218   :  { %441 = dma.done.wait [#allocation4], 128  }
 0x219   :  { %442 = vsyncadd [#allocation4], 4294967168 }
 0x21a   :  { %286 = vsyncpa [#allocation3], 1 }
 0x21b   :  { %287 = vsyncpa [#allocation6], 1 }
 0x21c   :  { %288 = vsyncpa [#allocation4], 1 }

</bundles_post_ra>
